<compile_context>
chip_gen: v5e
topology: v5e:2x2
jax: 0.10.0
libtpu: 0.0.40
codegen_flags: <defaults>
</compile_context>

<pallas_src>
import functools

import jax
import jax.numpy as jnp
from jax.experimental import pallas as pl
from jax.experimental.pallas import tpu as pltpu

NEG_INF_MASK = -1e9


def _lstm_pointer_kernel(x_ref, h0_ref, c0_ref, k_ref, mask_ref,
                         wih_ref, whh_ref, bg_ref,
                         wk_ref, bk_ref, v_ref,
                         logits_ref, h1_ref, c1_ref,
                         *, seq_len, clip, inv_temp):
    TB, H = h0_ref.shape
    S = seq_len

    x = x_ref[...]
    h0 = h0_ref[...]
    c0 = c0_ref[...]

    # ---- nn.LSTMCell step (torch gate order: i, f, g, o); biases pre-summed on host ----
    gates = (jnp.dot(x, wih_ref[...], preferred_element_type=jnp.float32)
             + jnp.dot(h0, whh_ref[...], preferred_element_type=jnp.float32)
             + bg_ref[...])
    i_g = jax.nn.sigmoid(gates[:, 0 * H:1 * H])
    f_g = jax.nn.sigmoid(gates[:, 1 * H:2 * H])
    g_g = jnp.tanh(gates[:, 2 * H:3 * H])
    o_g = jax.nn.sigmoid(gates[:, 3 * H:4 * H])
    c1 = f_g * c0 + i_g * g_g
    h1 = o_g * jnp.tanh(c1)
    h1_ref[...] = h1.astype(h1_ref.dtype)
    c1_ref[...] = c1.astype(c1_ref.dtype)

    # ---- key projection: one lane-dense 2-D matmul over the flattened (batch*seq) rows ----
    k_proj = (jnp.dot(k_ref[...], wk_ref[...], preferred_element_type=jnp.float32)
              + bk_ref[...])                                   # (TB*S, H)
    k_proj = k_proj.reshape(TB, S, H)                          # split sublane-major dim only

    # ---- additive attention logits: sum_d v_d * tanh(q + k) ----
    t = jnp.tanh(h1[:, None, :] + k_proj)                      # (TB, S, H), q broadcast over S
    logits = jnp.sum(v_ref[...] * t, axis=-1)                  # (TB, S)  lane reduce (XLU)
    logits = logits * inv_temp
    if clip is not None:
        logits = clip * jnp.tanh(logits)
    logits = logits + mask_ref[...] * NEG_INF_MASK
    logits_ref[...] = logits.astype(logits_ref.dtype)


def lstm_pointer_forward(x, h0, c0, k, mask, params, *, clip=10.0, temp=1.0):
    """Fused LstmPointerNetwork forward (additive attention).

    x:     (B, d_q)       query input for this decode step
    h0,c0: (B, d_model)   LSTM state (zeros at the start, as in the module)
    k:     (B, S, d_k)    encoder / candidate features
    mask:  (B, S)         1.0 where the position must be masked out
    params: (wih, bih, whh, bhh, wk, bk, v), weights stored [in, out].
    Returns (pointer_logits (B, S), h1 (B, d_model), c1 (B, d_model)).
    """
    wih, bih, whh, bhh, wk, bk, v = params
    B, d_q = x.shape
    _, S, d_k = k.shape
    H = whh.shape[0]

    TB = 8                                   # batch rows per grid step (sublane aligned)
    Bp = pl.cdiv(B, TB) * TB
    pad = Bp - B

    def pad_batch(a):
        if pad == 0:
            return a
        widths = ((0, pad),) + ((0, 0),) * (a.ndim - 1)
        return jnp.pad(a, widths)

    xp, h0p, c0p, k_pad, m_pad = (pad_batch(a) for a in (x, h0, c0, k, mask))
    k2 = k_pad.reshape(Bp * S, d_k)          # flatten (batch, seq) rows for the key projection
    b_gates = bih + bhh                      # pre-sum LSTM biases

    grid = (Bp // TB,)
    kernel = functools.partial(_lstm_pointer_kernel, seq_len=S, clip=clip,
                               inv_temp=1.0 / temp)

    def batch_spec(shape):
        return pl.BlockSpec(shape, lambda i: (i, 0))

    def const_spec(shape):
        return pl.BlockSpec(shape, lambda i: (0, 0))

    flops = (2 * Bp * (d_q + H) * 4 * H      # LSTM gate matmuls
             + 10 * Bp * H                   # LSTM elementwise
             + 2 * Bp * S * d_k * H          # key projection
             + 6 * Bp * S * H)               # broadcast add + v mul + reduce
    transcendentals = Bp * 5 * H + Bp * S * (H + 1)
    operands = (xp, h0p, c0p, k2, m_pad, wih, whh, b_gates, wk, bk, v)
    bytes_accessed = (sum(int(a.size) * a.dtype.itemsize for a in operands)
                      + (Bp * S + 2 * Bp * H) * 4)

    logits, h1, c1 = pl.pallas_call(
        kernel,
        out_shape=(
            jax.ShapeDtypeStruct((Bp, S), jnp.float32),
            jax.ShapeDtypeStruct((Bp, H), jnp.float32),
            jax.ShapeDtypeStruct((Bp, H), jnp.float32),
        ),
        grid_spec=pltpu.PrefetchScalarGridSpec(
            num_scalar_prefetch=0,
            grid=grid,
            in_specs=[
                batch_spec((TB, d_q)),        # x
                batch_spec((TB, H)),          # h0
                batch_spec((TB, H)),          # c0
                batch_spec((TB * S, d_k)),    # k (flattened batch*seq rows)
                batch_spec((TB, S)),          # mask (natural layout)
                const_spec((d_q, 4 * H)),     # wih   (VMEM-resident)
                const_spec((H, 4 * H)),       # whh
                const_spec((1, 4 * H)),       # bih + bhh
                const_spec((d_k, H)),         # wk
                const_spec((1, H)),           # bk
                const_spec((1, H)),           # v
            ],
            out_specs=[
                batch_spec((TB, S)),          # pointer logits (lane-dense over S)
                batch_spec((TB, H)),          # h1
                batch_spec((TB, H)),          # c1
            ],
        ),
        compiler_params=pltpu.CompilerParams(
            dimension_semantics=("parallel",)),
        cost_estimate=pl.CostEstimate(
            flops=flops,
            transcendentals=transcendentals,
            bytes_accessed=bytes_accessed),
    )(xp, h0p, c0p, k2, m_pad, wih, whh, b_gates, wk, bk, v)

    return logits[:B], h1[:B], c1[:B]


def init_params(key, d_q, d_k, d_model):
    """Deterministic init mirroring torch shapes; weights stored pre-transposed [in, out]."""
    ks = jax.random.split(key, 7)

    def unif(k, shape, fan):
        bound = 1.0 / (float(fan) ** 0.5)
        return jax.random.uniform(k, shape, jnp.float32, -bound, bound)

    wih = unif(ks[0], (d_q, 4 * d_model), d_model)        # LSTMCell: U(+-1/sqrt(hidden))
    bih = unif(ks[1], (1, 4 * d_model), d_model)
    whh = unif(ks[2], (d_model, 4 * d_model), d_model)
    bhh = unif(ks[3], (1, 4 * d_model), d_model)
    wk = unif(ks[4], (d_k, d_model), d_k)                 # nn.Linear: U(+-1/sqrt(fan_in))
    bk = unif(ks[5], (1, d_model), d_k)
    v = unif(ks[6], (1, d_model), d_model)                # additive-attention vector
    return wih, bih, whh, bhh, wk, bk, v


def lstm_pointer_reference(x, h0, c0, k, mask, params, clip=10.0, temp=1.0):
    """Pure-JAX reference of the module's forward (additive attention)."""
    wih, bih, whh, bhh, wk, bk, v = params
    H = h0.shape[-1]
    gates = x @ wih + bih + h0 @ whh + bhh
    i = jax.nn.sigmoid(gates[:, 0 * H:1 * H])
    f = jax.nn.sigmoid(gates[:, 1 * H:2 * H])
    g = jnp.tanh(gates[:, 2 * H:3 * H])
    o = jax.nn.sigmoid(gates[:, 3 * H:4 * H])
    c1 = f * c0 + i * g
    h1 = o * jnp.tanh(c1)
    kp = jnp.einsum('bsk,kd->bsd', k, wk) + bk            # (B, S, H)
    logits = jnp.sum(v[0] * jnp.tanh(h1[:, None, :] + kp), axis=-1)
    logits = logits / temp
    if clip is not None:
        logits = clip * jnp.tanh(logits)
    logits = logits + mask * NEG_INF_MASK
    return logits, h1, c1


if __name__ == "__main__":
    key = jax.random.PRNGKey(0)
    B, S = 2, 8                       # batch, number of pointer candidates
    d_q, d_k, d_model = 16, 16, 128   # d_model chosen lane-dense (128)

    key, kx, kk, km, kparam = jax.random.split(key, 5)
    x = jax.random.normal(kx, (B, d_q), jnp.float32)
    k = jax.random.normal(kk, (B, S, d_k), jnp.float32)
    mask = (jax.random.uniform(km, (B, S)) < 0.25).astype(jnp.float32)
    h0 = jnp.zeros((B, d_model), jnp.float32)   # module starts from a zero LSTM state
    c0 = jnp.zeros((B, d_model), jnp.float32)
    params = init_params(kparam, d_q, d_k, d_model)

    # module forward uses clip=10.0 and temp=self.temp (=1.0)
    logits, h1, c1 = lstm_pointer_forward(x, h0, c0, k, mask, params,
                                          clip=10.0, temp=1.0)
    logits = jax.block_until_ready(logits)

    ref_logits, ref_h1, ref_c1 = lstm_pointer_reference(
        x, h0, c0, k, mask, params, clip=10.0, temp=1.0)

    assert logits.shape == (B, S)
    assert jnp.allclose(logits, ref_logits, atol=1e-4, rtol=1e-4)
    assert jnp.allclose(h1, ref_h1, atol=1e-4, rtol=1e-4)
    assert jnp.allclose(c1, ref_c1, atol=1e-4, rtol=1e-4)

    print("KERNEL_OK")
</pallas_src>

<mosaic_0001>
module attributes {stable_mosaic.version = 11 : i64} {
  func.func @_lstm_pointer_kernel(%arg0: i32, %arg1: memref<8x16xf32, #tpu.memory_space<vmem>>, %arg2: memref<8x128xf32, #tpu.memory_space<vmem>>, %arg3: memref<8x128xf32, #tpu.memory_space<vmem>>, %arg4: memref<64x16xf32, #tpu.memory_space<vmem>>, %arg5: memref<8x8xf32, #tpu.memory_space<vmem>>, %arg6: memref<16x512xf32, #tpu.memory_space<vmem>>, %arg7: memref<128x512xf32, #tpu.memory_space<vmem>>, %arg8: memref<1x512xf32, #tpu.memory_space<vmem>>, %arg9: memref<16x128xf32, #tpu.memory_space<vmem>>, %arg10: memref<1x128xf32, #tpu.memory_space<vmem>>, %arg11: memref<1x128xf32, #tpu.memory_space<vmem>>, %arg12: memref<8x8xf32, #tpu.memory_space<vmem>>, %arg13: memref<8x128xf32, #tpu.memory_space<vmem>>, %arg14: memref<8x128xf32, #tpu.memory_space<vmem>>) attributes {dimension_semantics = [#tpu.dimension_semantics<parallel>], iteration_bounds = array<i64: 1>, scalar_prefetch = 0 : i64, scratch_operands = 0 : i64, tpu.core_type = #tpu.core_type<tc>, window_params = [{transform_indices = @transform_0, window_bounds = array<i64: 8, 16>}, {transform_indices = @transform_1, window_bounds = array<i64: 8, 128>}, {transform_indices = @transform_2, window_bounds = array<i64: 8, 128>}, {transform_indices = @transform_3, window_bounds = array<i64: 64, 16>}, {transform_indices = @transform_4, window_bounds = array<i64: 8, 8>}, {pipeline_mode = #tpu.pipeline_mode<synchronous>, transform_indices = @transform_5, window_bounds = array<i64: 16, 512>}, {pipeline_mode = #tpu.pipeline_mode<synchronous>, transform_indices = @transform_6, window_bounds = array<i64: 128, 512>}, {pipeline_mode = #tpu.pipeline_mode<synchronous>, transform_indices = @transform_7, window_bounds = array<i64: 1, 512>}, {pipeline_mode = #tpu.pipeline_mode<synchronous>, transform_indices = @transform_8, window_bounds = array<i64: 16, 128>}, {pipeline_mode = #tpu.pipeline_mode<synchronous>, transform_indices = @transform_9, window_bounds = array<i64: 1, 128>}, {pipeline_mode = #tpu.pipeline_mode<synchronous>, transform_indices = @transform_10, window_bounds = array<i64: 1, 128>}, {transform_indices = @transform_11, window_bounds = array<i64: 8, 8>}, {transform_indices = @transform_12, window_bounds = array<i64: 8, 128>}, {transform_indices = @transform_13, window_bounds = array<i64: 8, 128>}]} {
    %c0 = arith.constant 0 : index
    %c0_0 = arith.constant 0 : index
    %0 = vector.load %arg1[%c0, %c0_0] : memref<8x16xf32, #tpu.memory_space<vmem>>, vector<8x16xf32>
    %c0_1 = arith.constant 0 : index
    %c0_2 = arith.constant 0 : index
    %1 = vector.load %arg2[%c0_1, %c0_2] : memref<8x128xf32, #tpu.memory_space<vmem>>, vector<8x128xf32>
    %c0_3 = arith.constant 0 : index
    %c0_4 = arith.constant 0 : index
    %2 = vector.load %arg3[%c0_3, %c0_4] : memref<8x128xf32, #tpu.memory_space<vmem>>, vector<8x128xf32>
    %c0_5 = arith.constant 0 : index
    %c0_6 = arith.constant 0 : index
    %3 = vector.load %arg6[%c0_5, %c0_6] : memref<16x512xf32, #tpu.memory_space<vmem>>, vector<16x512xf32>
    %cst = arith.constant dense<0.000000e+00> : vector<8x512xf32>
    %4 = tpu.matmul %0, %3, %cst {dimension_numbers = #tpu.dot_dimension_numbers<[1], [0], [0], [1], [0, 0, 1, 1], [], []>} : vector<8x16xf32>, vector<16x512xf32>, vector<8x512xf32> -> vector<8x512xf32>
    %c0_7 = arith.constant 0 : index
    %c0_8 = arith.constant 0 : index
    %5 = vector.load %arg7[%c0_7, %c0_8] : memref<128x512xf32, #tpu.memory_space<vmem>>, vector<128x512xf32>
    %cst_9 = arith.constant dense<0.000000e+00> : vector<8x512xf32>
    %6 = tpu.matmul %1, %5, %cst_9 {dimension_numbers = #tpu.dot_dimension_numbers<[1], [0], [0], [1], [0, 0, 1, 1], [], []>} : vector<8x128xf32>, vector<128x512xf32>, vector<8x512xf32> -> vector<8x512xf32>
    %7 = arith.addf %4, %6 : vector<8x512xf32>
    %c0_10 = arith.constant 0 : index
    %c0_11 = arith.constant 0 : index
    %8 = vector.load %arg8[%c0_10, %c0_11] : memref<1x512xf32, #tpu.memory_space<vmem>>, vector<1x512xf32>
    %9 = vector.broadcast %8 : vector<1x512xf32> to vector<8x512xf32>
    %10 = arith.addf %7, %9 : vector<8x512xf32>
    %11 = vector.extract_strided_slice %10 {offsets = [0, 0], sizes = [8, 128], strides = [1, 1]} : vector<8x512xf32> to vector<8x128xf32>
    %12 = arith.negf %11 : vector<8x128xf32>
    %13 = math.exp %12 : vector<8x128xf32>
    %cst_12 = arith.constant 1.000000e+00 : f32
    %14 = vector.broadcast %cst_12 : f32 to vector<8x128xf32>
    %15 = arith.addf %14, %13 : vector<8x128xf32>
    %16 = arith.divf %14, %15 : vector<8x128xf32>
    %17 = vector.extract_strided_slice %10 {offsets = [0, 128], sizes = [8, 128], strides = [1, 1]} : vector<8x512xf32> to vector<8x128xf32>
    %18 = arith.negf %17 : vector<8x128xf32>
    %19 = math.exp %18 : vector<8x128xf32>
    %cst_13 = arith.constant 1.000000e+00 : f32
    %20 = vector.broadcast %cst_13 : f32 to vector<8x128xf32>
    %21 = arith.addf %20, %19 : vector<8x128xf32>
    %22 = arith.divf %20, %21 : vector<8x128xf32>
    %23 = vector.extract_strided_slice %10 {offsets = [0, 256], sizes = [8, 128], strides = [1, 1]} : vector<8x512xf32> to vector<8x128xf32>
    %24 = math.tanh %23 : vector<8x128xf32>
    %25 = vector.extract_strided_slice %10 {offsets = [0, 384], sizes = [8, 128], strides = [1, 1]} : vector<8x512xf32> to vector<8x128xf32>
    %26 = arith.negf %25 : vector<8x128xf32>
    %27 = math.exp %26 : vector<8x128xf32>
    %cst_14 = arith.constant 1.000000e+00 : f32
    %28 = vector.broadcast %cst_14 : f32 to vector<8x128xf32>
    %29 = arith.addf %28, %27 : vector<8x128xf32>
    %30 = arith.divf %28, %29 : vector<8x128xf32>
    %31 = arith.mulf %22, %2 : vector<8x128xf32>
    %32 = arith.mulf %16, %24 : vector<8x128xf32>
    %33 = arith.addf %31, %32 : vector<8x128xf32>
    %34 = math.tanh %33 : vector<8x128xf32>
    %35 = arith.mulf %30, %34 : vector<8x128xf32>
    %c0_15 = arith.constant 0 : index
    %c0_16 = arith.constant 0 : index
    %36 = vector.load %arg13[%c0_15, %c0_16] : memref<8x128xf32, #tpu.memory_space<vmem>>, vector<8x128xf32>
    tpu.vector_store %arg13[%c0_15, %c0_16], %35 {strides = array<i32>} : memref<8x128xf32, #tpu.memory_space<vmem>>, vector<8x128xf32>,
    %c0_17 = arith.constant 0 : index
    %c0_18 = arith.constant 0 : index
    %37 = vector.load %arg14[%c0_17, %c0_18] : memref<8x128xf32, #tpu.memory_space<vmem>>, vector<8x128xf32>
    tpu.vector_store %arg14[%c0_17, %c0_18], %33 {strides = array<i32>} : memref<8x128xf32, #tpu.memory_space<vmem>>, vector<8x128xf32>,
    %c0_19 = arith.constant 0 : index
    %c0_20 = arith.constant 0 : index
    %38 = vector.load %arg4[%c0_19, %c0_20] : memref<64x16xf32, #tpu.memory_space<vmem>>, vector<64x16xf32>
    %c0_21 = arith.constant 0 : index
    %c0_22 = arith.constant 0 : index
    %39 = vector.load %arg9[%c0_21, %c0_22] : memref<16x128xf32, #tpu.memory_space<vmem>>, vector<16x128xf32>
    %cst_23 = arith.constant dense<0.000000e+00> : vector<64x128xf32>
    %40 = tpu.matmul %38, %39, %cst_23 {dimension_numbers = #tpu.dot_dimension_numbers<[1], [0], [0], [1], [0, 0, 1, 1], [], []>} : vector<64x16xf32>, vector<16x128xf32>, vector<64x128xf32> -> vector<64x128xf32>
    %c0_24 = arith.constant 0 : index
    %c0_25 = arith.constant 0 : index
    %41 = vector.load %arg10[%c0_24, %c0_25] : memref<1x128xf32, #tpu.memory_space<vmem>>, vector<1x128xf32>
    %42 = vector.broadcast %41 : vector<1x128xf32> to vector<64x128xf32>
    %43 = arith.addf %40, %42 : vector<64x128xf32>
    %44 = vector.shape_cast %43 : vector<64x128xf32> to vector<8x8x128xf32>
    %45 = vector.shape_cast %35 : vector<8x128xf32> to vector<8x1x128xf32>
    %46 = vector.broadcast %45 : vector<8x1x128xf32> to vector<8x8x128xf32>
    %47 = arith.addf %46, %44 : vector<8x8x128xf32>
    %48 = math.tanh %47 : vector<8x8x128xf32>
    %c0_26 = arith.constant 0 : index
    %c0_27 = arith.constant 0 : index
    %49 = vector.load %arg11[%c0_26, %c0_27] : memref<1x128xf32, #tpu.memory_space<vmem>>, vector<1x128xf32>
    %50 = vector.shape_cast %49 : vector<1x128xf32> to vector<1x1x128xf32>
    %51 = vector.broadcast %50 : vector<1x1x128xf32> to vector<8x8x128xf32>
    %52 = arith.mulf %51, %48 : vector<8x8x128xf32>
    %cst_28 = arith.constant dense<0.000000e+00> : vector<8x8xf32>
    %53 = vector.multi_reduction <add>, %52, %cst_28 [2] : vector<8x8x128xf32> to vector<8x8xf32>
    %cst_29 = arith.constant 1.000000e+00 : f32
    %54 = vector.broadcast %cst_29 : f32 to vector<8x8xf32>
    %55 = arith.mulf %53, %54 : vector<8x8xf32>
    %56 = math.tanh %55 : vector<8x8xf32>
    %cst_30 = arith.constant 1.000000e+01 : f32
    %57 = vector.broadcast %cst_30 : f32 to vector<8x8xf32>
    %58 = arith.mulf %57, %56 : vector<8x8xf32>
    %c0_31 = arith.constant 0 : index
    %c0_32 = arith.constant 0 : index
    %59 = vector.load %arg5[%c0_31, %c0_32] : memref<8x8xf32, #tpu.memory_space<vmem>>, vector<8x8xf32>
    %cst_33 = arith.constant -1.000000e+09 : f32
    %60 = vector.broadcast %cst_33 : f32 to vector<8x8xf32>
    %61 = arith.mulf %59, %60 : vector<8x8xf32>
    %62 = arith.addf %58, %61 : vector<8x8xf32>
    %c0_34 = arith.constant 0 : index
    %c0_35 = arith.constant 0 : index
    %63 = vector.load %arg12[%c0_34, %c0_35] : memref<8x8xf32, #tpu.memory_space<vmem>>, vector<8x8xf32>
    tpu.vector_store %arg12[%c0_34, %c0_35], %62 {strides = array<i32>} : memref<8x8xf32, #tpu.memory_space<vmem>>, vector<8x8xf32>,
    return
  }
  func.func @transform_0(%arg0: i32) -> (i32, i32) {
    %c0_i32 = arith.constant 0 : i32
    %c0_i32_0 = arith.constant 0 : i32
    return %arg0, %c0_i32 : i32, i32
  }
  func.func @transform_1(%arg0: i32) -> (i32, i32) {
    %c0_i32 = arith.constant 0 : i32
    %c0_i32_0 = arith.constant 0 : i32
    return %arg0, %c0_i32 : i32, i32
  }
  func.func @transform_2(%arg0: i32) -> (i32, i32) {
    %c0_i32 = arith.constant 0 : i32
    %c0_i32_0 = arith.constant 0 : i32
    return %arg0, %c0_i32 : i32, i32
  }
  func.func @transform_3(%arg0: i32) -> (i32, i32) {
    %c0_i32 = arith.constant 0 : i32
    %c0_i32_0 = arith.constant 0 : i32
    return %arg0, %c0_i32 : i32, i32
  }
  func.func @transform_4(%arg0: i32) -> (i32, i32) {
    %c0_i32 = arith.constant 0 : i32
    %c0_i32_0 = arith.constant 0 : i32
    return %arg0, %c0_i32 : i32, i32
  }
  func.func @transform_5(%arg0: i32) -> (i32, i32) {
    %c0_i32 = arith.constant 0 : i32
    %c0_i32_0 = arith.constant 0 : i32
    %c0_i32_1 = arith.constant 0 : i32
    return %c0_i32, %c0_i32_0 : i32, i32
  }
  func.func @transform_6(%arg0: i32) -> (i32, i32) {
    %c0_i32 = arith.constant 0 : i32
    %c0_i32_0 = arith.constant 0 : i32
    %c0_i32_1 = arith.constant 0 : i32
    return %c0_i32, %c0_i32_0 : i32, i32
  }
  func.func @transform_7(%arg0: i32) -> (i32, i32) {
    %c0_i32 = arith.constant 0 : i32
    %c0_i32_0 = arith.constant 0 : i32
    %c0_i32_1 = arith.constant 0 : i32
    return %c0_i32, %c0_i32_0 : i32, i32
  }
  func.func @transform_8(%arg0: i32) -> (i32, i32) {
    %c0_i32 = arith.constant 0 : i32
    %c0_i32_0 = arith.constant 0 : i32
    %c0_i32_1 = arith.constant 0 : i32
    return %c0_i32, %c0_i32_0 : i32, i32
  }
  func.func @transform_9(%arg0: i32) -> (i32, i32) {
    %c0_i32 = arith.constant 0 : i32
    %c0_i32_0 = arith.constant 0 : i32
    %c0_i32_1 = arith.constant 0 : i32
    return %c0_i32, %c0_i32_0 : i32, i32
  }
  func.func @transform_10(%arg0: i32) -> (i32, i32) {
    %c0_i32 = arith.constant 0 : i32
    %c0_i32_0 = arith.constant 0 : i32
    %c0_i32_1 = arith.constant 0 : i32
    return %c0_i32, %c0_i32_0 : i32, i32
  }
  func.func @transform_11(%arg0: i32) -> (i32, i32) {
    %c0_i32 = arith.constant 0 : i32
    %c0_i32_0 = arith.constant 0 : i32
    return %arg0, %c0_i32 : i32, i32
  }
  func.func @transform_12(%arg0: i32) -> (i32, i32) {
    %c0_i32 = arith.constant 0 : i32
    %c0_i32_0 = arith.constant 0 : i32
    return %arg0, %c0_i32 : i32, i32
  }
  func.func @transform_13(%arg0: i32) -> (i32, i32) {
    %c0_i32 = arith.constant 0 : i32
    %c0_i32_0 = arith.constant 0 : i32
    return %arg0, %c0_i32 : i32, i32
  }
}

</mosaic_0001>

<bundles_post_ra>
// kernel: tpu_custom_call.1
= control target key start
LH: loop header
LB: loop body
LE: loop exit
PB: predicated region body
PF: predicated region fallthrough
CT: control target
= control target key end

     0   :  { %19 = vsyncpa [#allocation3], 0  ;;  %s1262_s0 = inlined_call_operand.hbm [shape: f32[8,16], index: 0, kind: input, shape index: {}]   ;;  %s1263_s1 = inlined_call_operand.hbm [shape: f32[8,128], index: 1, kind: input, shape index: {}]   ;;  %s1264_s2 = inlined_call_operand.hbm [shape: f32[8,128], index: 2, kind: input, shape index: {}]   ;;  %s1265_s3 = inlined_call_operand.vmem [shape: f32[64,16], index: 3, kind: input, shape index: {}]   ;;  %s1266_s4 = inlined_call_operand.hbm [shape: f32[8,8], index: 4, kind: input, shape index: {}]   ;;  %s1267_s5 = inlined_call_operand.vmem [shape: f32[16,512], index: 5, kind: input, shape index: {}]   ;;  %s1268_s6 = inlined_call_operand.hbm [shape: f32[128,512], index: 6, kind: input, shape index: {}]   ;;  %s1269_s7 = inlined_call_operand.vmem [shape: f32[1,512], index: 7, kind: input, shape index: {}]   ;;  %s1270_s8 = inlined_call_operand.vmem [shape: f32[16,128], index: 8, kind: input, shape index: {}]   ;;  %s1271_s9 = inlined_call_operand.vmem [shape: f32[1,128], index: 9, kind: input, shape index: {}]   ;;  %s1272_s10 = inlined_call_operand.vmem [shape: f32[1,128], index: 10, kind: input, shape index: {}]   ;;  %s1273_s11 = inlined_call_operand.hbm [shape: f32[8,8], index: 11, kind: output, shape index: {0}]   ;;  %s1274_s12 = inlined_call_operand.hbm [shape: f32[8,128], index: 12, kind: output, shape index: {1}]   ;;  %s1275_s13 = inlined_call_operand.hbm [shape: f32[8,128], index: 13, kind: output, shape index: {2}]  }
   0x1   :  { %20 = vsyncpa [#allocation6], 0 }
   0x2   :  { %21 = vsyncpa [#allocation9], 0 }
   0x3   :  { %22 = vsyncpa [#allocation4], 0  ;;  %s40_s27 = sshll.u32 %s1263_s1, 4  ;;  %s41_s27 = int_to_ptr.hbm [resolvable:$true] %s40_s27 }
   0x4   :  { %23 = vsyncpa [#allocation13], 0  ;;  %s1062_s28 = smov [#allocation5]   ;;  %s64_s15 = sshll.u32 %s1266_s4, 4  ;;  %s65_s15 = int_to_ptr.hbm [resolvable:$true] %s64_s15 }
   0x5   :  { %s42_s29 = sshll.u32 %s1062_s28, 4  ;;  %s1063_s16 = smov [#allocation8]   ;;  %s43_s29 = int_to_ptr.vmem [resolvable:$true] %s42_s29 }
   0x6   :  { %45 = dma.hbm_to_vmem [thread:$0]  %s41_s27, 128, %s43_s29, [#allocation6]  }
   0x7   :  { %s66_s17 = sshll.u32 %s1063_s16, 4  ;;  %s29_s20 = sshll.u32 %s1262_s0, 4  ;;  %s67_s17 = int_to_ptr.vmem [resolvable:$true] %s66_s17  ;;  %s30_s20 = int_to_ptr.hbm [resolvable:$true] %s29_s20 }
   0x8   :  { %69 = dma.hbm_to_vmem [thread:$0]  %s65_s15, 128, %s67_s17, [#allocation9]  }
   0x9   :  { %s51_s22 = sshll.u32 %s1264_s2, 4  ;;  %s1064_s23 = smov [#allocation2]   ;;  %s52_s22 = int_to_ptr.hbm [resolvable:$true] %s51_s22 }
   0xa   :  { %s31_s24 = sshll.u32 %s1064_s23, 4  ;;  %s1065_s4 = smov [#allocation7]   ;;  %s32_s24 = int_to_ptr.vmem [resolvable:$true] %s31_s24 }
   0xb   :  { %34 = dma.hbm_to_vmem [thread:$0]  %s30_s20, 128, %s32_s24, [#allocation3]  }
   0xc   :  { %s53_s25 = sshll.u32 %s1065_s4, 4  ;;  %s76_s28 = sshll.u32 %s1268_s6, 4  ;;  %s54_s25 = int_to_ptr.vmem [resolvable:$true] %s53_s25  ;;  %s77_s28 = int_to_ptr.hbm [resolvable:$true] %s76_s28 }
   0xd   :  { %56 = dma.hbm_to_vmem [thread:$0]  %s52_s22, 128, %s54_s25, [#allocation6]  }
   0xe   :  { %s1066_s0 = smov [#allocation10]   ;;  %s1067_s30 = smov 512  }
   0xf   :  { %s78_s29 = sshll.u32 %s1066_s0, 4  ;;  %s1068_s14 = smov 32   ;;  %s79_s29 = int_to_ptr.vmem [resolvable:$true] %s78_s29 }
  0x10   :  { %84 = dma.hbm_to_vmem [thread:$0]  %s77_s28, 8192, %s79_s29, [#allocation9], %s1067_s30, %s1067_s30, %s1068_s14  }
  0x11   :  { %1052 = dma.done.wait [#allocation3], 128  }
  0x12   :  { %1053 = vsyncadd [#allocation3], 4294967168 }
  0x13   :  { %1054 = dma.done.wait [#allocation6], 256  }
  0x14   :  { %1055 = vsyncadd [#allocation6], 4294967040 }
  0x15   :  { %1056 = dma.done.wait [#allocation9], 8320  }
  0x16   :  { %1057 = vsyncadd [#allocation9], 4294958976  ;;  %v184_v0 = vld [vmem:[#allocation10 + $0x1e0] sm:$0xff]  ;;  %v187_v1 = vld [vmem:[#allocation10 + $0x1f8] sm:$0xff]  ;;  %vm268_vm0 = vcmask 130048   ;;  %s746_s26 = sshll.u32 %s1274_s12, 4  ;;  %s747_s26 = int_to_ptr.hbm [resolvable:$true] %s746_s26 }
  0x17   :  { %v186_v2 = vld [vmem:[#allocation10 + $0x1f0] sm:$0xff]  ;;  %188 = vmatpush.msra.mxu1 %v184_v0  ;;  %248 = vmatpush.msra.mxu3 %v187_v1  ;;  %v180_v3 = vld [vmem:[#allocation10 + $0x1c0] sm:$0xff]  ;;  %v183_v4 = vld [vmem:[#allocation10 + $0x1d8] sm:$0xff]  ;;  %s1070_s27 = smov [#allocation12]   ;;  %s757_s30 = sshll.u32 %s1275_s13, 4  ;;  %vm711_vm13 = vcmask 1041409   ;;  %s758_s30 = int_to_ptr.hbm [resolvable:$true] %s757_s30 }
  0x18   :  { %v182_v5 = vld [vmem:[#allocation10 + $0x1d0] sm:$0xff]  ;;  %228 = vmatpush.msra.mxu2 %v186_v2  ;;  %v176_v6 = vld [vmem:[#allocation10 + $0x1a0] sm:$0xff]  ;;  %v179_v7 = vld [vmem:[#allocation10 + $0x1b8] sm:$0xff]  ;;  %s744_s28 = sshll.u32 %s1070_s27, 4  ;;  %s1071_s12 = smov [#allocation14]   ;;  %vm713_vm14 = vcmask 1042434   ;;  %s745_s28 = int_to_ptr.vmem [resolvable:$true] %s744_s28 }
  0x19   :  { %189 = vmatpush.msra.mxu1 %v180_v3  ;;  %249 = vmatpush.msra.mxu3 %v183_v4  ;;  %v178_v8 = vld [vmem:[#allocation10 + $0x1b0] sm:$0xff]  ;;  %v172_v9 = vld [vmem:[#allocation10 + $0x180] sm:$0xff]  ;;  %v175_v10 = vld [vmem:[#allocation10 + $0x198] sm:$0xff]  ;;  %s755_s14 = sshll.u32 %s1071_s12, 4  ;;  %vm715_vm15 = vcmask 1043459   ;;  %s1072_s13 = smov [#allocation11]   ;;  %s756_s14 = int_to_ptr.vmem [resolvable:$true] %s755_s14 }
  0x1a   :  { %229 = vmatpush.msra.mxu2 %v182_v5  ;;  %v174_v11 = vld [vmem:[#allocation10 + $0x190] sm:$0xff]  ;;  %v168_v12 = vld [vmem:[#allocation10 + $0x160] sm:$0xff]  ;;  %v171_v13 = vld [vmem:[#allocation10 + $0x178] sm:$0xff]  ;;  %s733_s2 = sshll.u32 %s1072_s13, 4  ;;  %s734_s2 = int_to_ptr.vmem [resolvable:$true] %s733_s2 }
  0x1b   :  { %190 = vmatpush.msra.mxu1 %v176_v6  ;;  %250 = vmatpush.msra.mxu3 %v179_v7  ;;  %v170_v14 = vld [vmem:[#allocation10 + $0x170] sm:$0xff]  ;;  %v164_v15 = vld [vmem:[#allocation10 + $0x140] sm:$0xff]  ;;  %v167_v16 = vld [vmem:[#allocation10 + $0x158] sm:$0xff] }
  0x1c   :  { %230 = vmatpush.msra.mxu2 %v178_v8  ;;  %v166_v17 = vld [vmem:[#allocation10 + $0x150] sm:$0xff]  ;;  %v160_v18 = vld [vmem:[#allocation10 + $0x120] sm:$0xff]  ;;  %v163_v19 = vld [vmem:[#allocation10 + $0x138] sm:$0xff] }
  0x1d   :  { %191 = vmatpush.msra.mxu1 %v172_v9  ;;  %251 = vmatpush.msra.mxu3 %v175_v10  ;;  %v162_v20 = vld [vmem:[#allocation10 + $0x130] sm:$0xff]  ;;  %v156_v21 = vld [vmem:[#allocation10 + $0x100] sm:$0xff]  ;;  %v159_v22 = vld [vmem:[#allocation10 + $0x118] sm:$0xff] }
  0x1e   :  { %231 = vmatpush.msra.mxu2 %v174_v11  ;;  %v158_v23 = vld [vmem:[#allocation10 + $0x110] sm:$0xff]  ;;  %v152_v24 = vld [vmem:[#allocation10 + $0xe0] sm:$0xff]  ;;  %v155_v25 = vld [vmem:[#allocation10 + $0xf8] sm:$0xff] }
  0x1f   :  { %192 = vmatpush.msra.mxu1 %v168_v12  ;;  %252 = vmatpush.msra.mxu3 %v171_v13  ;;  %v154_v26 = vld [vmem:[#allocation10 + $0xf0] sm:$0xff]  ;;  %v148_v27 = vld [vmem:[#allocation10 + $0xc0] sm:$0xff]  ;;  %v151_v28 = vld [vmem:[#allocation10 + $0xd8] sm:$0xff] }
  0x20   :  { %232 = vmatpush.msra.mxu2 %v170_v14  ;;  %v150_v29 = vld [vmem:[#allocation10 + $0xd0] sm:$0xff]  ;;  %v144_v30 = vld [vmem:[#allocation10 + $0xa0] sm:$0xff]  ;;  %v147_v31 = vld [vmem:[#allocation10 + $0xb8] sm:$0xff]  ;;  %v598_v14 = vlaneseq }
  0x21   :  { %193 = vmatpush.msra.mxu1 %v164_v15  ;;  %253 = vmatpush.msra.mxu3 %v167_v16  ;;  %v146_v32 = vld [vmem:[#allocation10 + $0xb0] sm:$0xff]  ;;  %v140_v33 = vld [vmem:[#allocation10 + $0x80] sm:$0xff]  ;;  %v143_v34 = vld [vmem:[#allocation10 + $0x98] sm:$0xff] }
  0x22   :  { %233 = vmatpush.msra.mxu2 %v166_v17  ;;  %v142_v35 = vld [vmem:[#allocation10 + $0x90] sm:$0xff]  ;;  %v136_v36 = vld [vmem:[#allocation10 + $0x60] sm:$0xff]  ;;  %v139_v37 = vld [vmem:[#allocation10 + $0x78] sm:$0xff]  ;;  %v599_v16 = vshrl.u32 %v598_v14, 7 }
  0x23   :  { %194 = vmatpush.msra.mxu1 %v160_v18  ;;  %254 = vmatpush.msra.mxu3 %v163_v19  ;;  %v440_v38 = vld [vmem:[%s1270_s8 + $0x8] sm:$0xff]  ;;  %v138_v39 = vld [vmem:[#allocation10 + $0x70] sm:$0xff]  ;;  %v439_v40 = vld [vmem:[%s1270_s8] sm:$0xff] }
  0x24   :  { %234 = vmatpush.msra.mxu2 %v162_v20  ;;  %v132_v41 = vld [vmem:[#allocation10 + $0x40] sm:$0xff]  ;;  %v135_v42 = vld [vmem:[#allocation10 + $0x58] sm:$0xff]  ;;  %v134_v43 = vld [vmem:[#allocation10 + $0x50] sm:$0xff]  ;;  %483 = vmatpush.msra.mxu0 %v440_v38 }
  0x25   :  { %195 = vmatpush.msra.mxu1 %v156_v21  ;;  %255 = vmatpush.msra.mxu3 %v159_v22  ;;  %v431_v44 = vld [vmem:[%s1265_s3] sm:$0xff]  ;;  %v131_v46 = vld [vmem:[#allocation10 + $0x38] sm:$0xff]  ;;  %v130_v47 = vld [vmem:[#allocation10 + $0x30] sm:$0xff] }
  0x26   :  { %235 = vmatpush.msra.mxu2 %v158_v23  ;;  %v128_v45 = vld [vmem:[#allocation10 + $0x20] sm:$0xff]  ;;  %484 = vmatpush.msra.mxu0 %v439_v40  ;;  %v127_v49 = vld [vmem:[#allocation10 + $0x18] sm:$0xff]  ;;  %v185_v50 = vld [vmem:[#allocation10 + $0x1e8] sm:$0xff] }
  0x27   :  { %196 = vmatpush.msra.mxu1 %v152_v24  ;;  %256 = vmatpush.msra.mxu3 %v155_v25  ;;  %v124_v48 = vld [vmem:[#allocation10] sm:$0xff]  ;;  %v126_v51 = vld [vmem:[#allocation10 + $0x10] sm:$0xff]  ;;  %v1168_v52 = vld [vmem:[#allocation5] sm:$0xff] }
  0x28   :  { %236 = vmatpush.msra.mxu2 %v154_v26  ;;  %785 = vmatmul.msk.f32.vlgmr.msra.gmra.mxu0 %vm268_vm0, %v431_v44  ;;  %v181_v53 = vld [vmem:[#allocation10 + $0x1c8] sm:$0xff]  ;;  %v120_v54 = vld [vmem:[%s1267_s5 + $0x20] sm:$0xff]  ;;  %v123_v59 = vld [vmem:[%s1267_s5 + $0x38] sm:$0xff] }
  0x29   :  { %197 = vmatpush.msra.mxu1 %v148_v27  ;;  %257 = vmatpush.msra.mxu3 %v151_v28  ;;  %v121_v55 = vld [vmem:[%s1267_s5 + $0x28] sm:$0xff]  ;;  %v116_v57 = vld [vmem:[%s1267_s5] sm:$0xff]  ;;  %v122_v61 = vld [vmem:[%s1267_s5 + $0x30] sm:$0xff] }
  0x2a   :  { %237 = vmatpush.msra.mxu2 %v150_v29  ;;  %v177_v56 = vld [vmem:[#allocation10 + $0x1a8] sm:$0xff]  ;;  %v119_v62 = vld [vmem:[%s1267_s5 + $0x18] sm:$0xff]  ;;  %v118_v1 = vld [vmem:[%s1267_s5 + $0x10] sm:$0xff]  ;;  %804 = vset.pattern.permute.xlu2 %v599_v16 }
  0x2b   :  { %198 = vmatpush.msra.mxu1 %v144_v30  ;;  %258 = vmatpush.msra.mxu3 %v147_v31  ;;  %v117_v58 = vld [vmem:[%s1267_s5 + $0x8] sm:$0xff]  ;;  %v113_v2 = vld [vmem:[#allocation2] sm:$0xff]  ;;  %v433_v6 = vld [vmem:[%s1265_s3 + $0x10] sm:$0xff]  ;;  %s735_s5 = sshll.u32 %s1273_s11, 4  ;;  %s736_s5 = int_to_ptr.hbm [resolvable:$true] %s735_s5 }
  0x2c   :  { %238 = vmatpush.msra.mxu2 %v146_v32  ;;  %v173_v60 = vld [vmem:[#allocation10 + $0x188] sm:$0xff]  ;;  %v434_v11 = vld [vmem:[%s1265_s3 + $0x18] sm:$0xff]  ;;  %806 = vset.pattern.permute.xlu1 %v599_v16  ;;  %v435_v18 = vld [vmem:[%s1265_s3 + $0x20] sm:$0xff] }
  0x2d   :  { %199 = vmatpush.msra.mxu1 %v140_v33  ;;  %259 = vmatpush.msra.mxu3 %v143_v34  ;;  %v432_v63 = vld [vmem:[%s1265_s3 + $0x8] sm:$0xff]  ;;  %v437_v20 = vld [vmem:[%s1265_s3 + $0x30] sm:$0xff]  ;;  %v438_v21 = vld [vmem:[%s1265_s3 + $0x38] sm:$0xff] }
  0x2e   :  { %239 = vmatpush.msra.mxu2 %v142_v35  ;;  %v169_v0 = vld [vmem:[#allocation10 + $0x168] sm:$0xff]  ;;  %805 = vset.pattern.permute.xlu0 %v599_v16  ;;  %v594_v22 = vld [vmem:[#allocation8] sm:$0xff]  ;;  %v352_v32 = vld [vmem:[%s1269_s7] sm:$0xf] }
  0x2f   :  { %200 = vmatpush.msra.mxu1 %v136_v36  ;;  %260 = vmatpush.msra.mxu3 %v139_v37  ;;  %v165_v3 = vld [vmem:[#allocation10 + $0x148] sm:$0xff]  ;;  %v595_v23 = vmul.f32 -1e+09, %v594_v22  ;;  %v354_v34 = vperm.slane %v352_v32, 0 }
  0x30   :  { %240 = vmatpush.msra.mxu2 %v138_v39  ;;  %786 = vmatmul.msk.f32.gmra.mxu0 %vm268_vm0, %v432_v63  ;;  %v161_v4 = vld [vmem:[#allocation10 + $0x128] sm:$0xff] }
  0x31   :  { %201 = vmatpush.msra.mxu1 %v132_v41  ;;  %261 = vmatpush.msra.mxu3 %v135_v42  ;;  %v157_v5 = vld [vmem:[#allocation10 + $0x108] sm:$0xff]  ;;  %v597_v24 = vperm.slane %v595_v23, 0  ;;  %v618_v25 = vperm.slane %v595_v23, 3  ;;  %v611_v26 = vperm.slane %v595_v23, 2  ;;  %v625_v27 = vperm.slane %v595_v23, 4 }
  0x32   :  { %241 = vmatpush.msra.mxu2 %v134_v43  ;;  %v153_v7 = vld [vmem:[#allocation10 + $0xe8] sm:$0xff]  ;;  %v632_v28 = vperm.slane %v595_v23, 5  ;;  %v639_v29 = vperm.slane %v595_v23, 6  ;;  %v646_v30 = vperm.slane %v595_v23, 7  ;;  %v604_v36 = vperm.slane %v595_v23, 1 }
  0x33   :  { %202 = vmatpush.msra.mxu1 %v128_v45  ;;  %262 = vmatpush.msra.mxu3 %v131_v46  ;;  %v149_v8 = vld [vmem:[#allocation10 + $0xc8] sm:$0xff]  ;;  %v357_v42 = vperm.slane %v352_v32, 3 }
  0x34   :  { %242 = vmatpush.msra.mxu2 %v130_v47  ;;  %v145_v9 = vld [vmem:[#allocation10 + $0xa8] sm:$0xff]  ;;  %602 = vperm.xlu2 %804, %v597_v24   ;;  %v115_v24 = vld [vmem:[#allocation7] sm:$0xff] }
  0x35   :  { %203 = vmatpush.msra.mxu1 %v124_v48  ;;  %263 = vmatpush.msra.mxu3 %v127_v49  ;;  %v141_v10 = vld [vmem:[#allocation10 + $0x88] sm:$0xff] }
  0x36   :  { %243 = vmatpush.msra.mxu2 %v126_v51  ;;  %264 = vmatmul.f32.vlgmr.msra.gmra.mxu3 %v1168_v52  ;;  %v137_v12 = vld [vmem:[#allocation10 + $0x68] sm:$0xff] }
  0x37   :  { %208 = vmatpush.msrb.mxu1 %v185_v50  ;;  %244 = vmatmul.f32.vlgmr.msra.gmra.mxu2 %v1168_v52  ;;  %v133_v13 = vld [vmem:[#allocation10 + $0x48] sm:$0xff]  ;;  %v355_v50 = vperm.slane %v352_v32, 1 }
  0x38   :  { %286 = vmatpush.msrb.mxu3 %v120_v54  ;;  %306 = vmatpush.msrb.mxu2 %v121_v55  ;;  %v129_v15 = vld [vmem:[#allocation10 + $0x28] sm:$0xff] }
  0x39   :  { %209 = vmatpush.msrb.mxu1 %v181_v53  ;;  %787 = vmatmul.msk.f32.gmra.mxu0 %vm268_vm0, %v433_v6  ;;  %v125_v17 = vld [vmem:[#allocation10 + $0x8] sm:$0xff] }
  0x3a   :  { %204 = vmatmul.f32.vlgmr.msra.gmra.mxu1 %v1168_v52  ;;  %287 = vmatpush.msrb.mxu3 %v116_v57  ;;  %v436_v19 = vld [vmem:[%s1265_s3 + $0x28] sm:$0xff] }
  0x3b   :  { %210 = vmatpush.msrb.mxu1 %v177_v56  ;;  %307 = vmatpush.msrb.mxu2 %v117_v58 }
  0x3c   :  { %346 = vmatpush.msra.mxu3 %v123_v59  ;;  %623 = vperm.xlu2 %804, %v618_v25  }
  0x3d   :  { %211 = vmatpush.msrb.mxu1 %v173_v60  ;;  %326 = vmatpush.msra.mxu2 %v122_v61 }
  0x3e   :  { %347 = vmatpush.msra.mxu3 %v119_v62  ;;  %616 = vperm.xlu1 %806, %v611_v26  }
  0x3f   :  { %212 = vmatpush.msrb.mxu1 %v169_v0  ;;  %327 = vmatpush.msra.mxu2 %v118_v1 }
  0x40   :  { %778 = vmatmul.msk.f32.vlgmr.msrb.gmra.mxu3 %vm268_vm0, %v113_v2  ;;  %779 = vmatmul.msk.f32.vlgmr.msrb.gmra.mxu2 %vm268_vm0, %v113_v2 }
  0x41   :  { %213 = vmatpush.msrb.mxu1 %v165_v3  ;;  %788 = vmatmul.msk.f32.gmra.mxu0 %vm268_vm0, %v434_v11  ;;  %v356_v3 = vperm.slane %v352_v32, 2 }
  0x42   :  { %609 = vperm.xlu0 %805, %v604_v36  }
  0x43   :  { %214 = vmatpush.msrb.mxu1 %v161_v4 }
  0x44   :  { %630 = vperm.xlu2 %804, %v625_v27  }
  0x45   :  { %215 = vmatpush.msrb.mxu1 %v157_v5 }
  0x46   :  { %637 = vperm.xlu1 %806, %v632_v28  }
  0x47   :  { %216 = vmatpush.msrb.mxu1 %v153_v7 }
  0x48   :  { %781 = vmatmul.msk.f32.vlgmr.msra.gmra.mxu3 %vm268_vm0, %v113_v2  ;;  %780 = vmatmul.msk.f32.vlgmr.msra.gmra.mxu2 %vm268_vm0, %v113_v2 }
  0x49   :  { %217 = vmatpush.msrb.mxu1 %v149_v8  ;;  %789 = vmatmul.msk.f32.gmra.mxu0 %vm268_vm0, %v435_v18 }
  0x4b   :  { %218 = vmatpush.msrb.mxu1 %v145_v9 }
  0x4c   :  { %644 = vperm.xlu2 %804, %v639_v29  }
  0x4d   :  { %219 = vmatpush.msrb.mxu1 %v141_v10 }
  0x4e   :  { %651 = vperm.xlu1 %806, %v646_v30  }
  0x4f   :  { %220 = vmatpush.msrb.mxu1 %v137_v12 }
  0x51   :  { %221 = vmatpush.msrb.mxu1 %v133_v13  ;;  %790 = vmatmul.msk.f32.gmra.mxu0 %vm268_vm0, %v436_v19 }
  0x53   :  { %222 = vmatpush.msrb.mxu1 %v129_v15 }
  0x55   :  { %223 = vmatpush.msrb.mxu1 %v125_v17 }
  0x56   :  { %224 = vmatmul.f32.vlgmr.msrb.gmra.mxu1 %v1168_v52 }
  0x59   :  { %791 = vmatmul.msk.f32.gmra.mxu0 %vm268_vm0, %v437_v20 }
  0x61   :  { %792 = vmatmul.msk.f32.gmra.mxu0 %vm268_vm0, %v438_v21  ;;  %vm717_vm0 = vcmask 1044484  }
  0xa5   :  { %v1234_v38 = vpop.f32.mrf.mxu0 }
  0xad   :  { %v1236_v46 = vpop.f32.mrf.mxu0 }
  0xb6   :  { %v1238_v56 = vpop.f32.mrf.mxu0 }
  0xb7   :  { %v205_v33 = vpop.f32.mrf.mxu1 }
  0xb9   :  { %v265_v31 = vpop.f32.mrf.mxu3 }
  0xba   :  { %v245_v41 = vpop.f32.mrf.mxu2 }
  0xbe   :  { %v1240_v1 = vpop.f32.mrf.mxu0 }
  0xc3   :  { %v289_v35 = vpop.f32.mrf.mxu3  ;;  %v309_v51 = vpop.f32.mrf.mxu2 }
  0xc4   :  { %v290_v37 = vadd.f32 %v289_v35, %v205_v33 }
  0xc6   :  { %v362_v39 = vadd.f32 %v354_v34, %v290_v37  ;;  %v498_v15 = vpop.f32.mrf.mxu0 }
  0xc8   :  { %v782_v40 = vmul.f32 -1.442695, %v362_v39 }
  0xca   :  { %812 = vpow2.f32 %v782_v40 }
  0xcb   :  { %v349_v43 = vpop.f32.mrf.mxu3  ;;  %v329_v0 = vpop.f32.mrf.mxu2 }
  0xcc   :  { %v350_v44 = vadd.f32 %v349_v43, %v265_v31  ;;  %v330_v2 = vadd.f32 %v329_v0, %v245_v41 }
  0xce   :  { %v365_v45 = vadd.f32 %v357_v42, %v350_v44  ;;  %v364_v7 = vadd.f32 %v356_v3, %v330_v2  ;;  %v501_v33 = vpop.f32.mrf.mxu0  ;;  %v810_v42 = vld [vmem:[%s1271_s9] ss:$0 sm:$0xff] }
  0xcf   :  { %v490_v0 = vadd.f32 %v810_v42, %v1236_v46 }
  0xd0   :  { %v813_v47 = vpop.eup %812  ;;  %v784_v48 = vmul.f32 -1.442695, %v365_v45 }
  0xd1   :  { %v369_v49 = vadd.f32 1.0, %v813_v47 }
  0xd2   :  { %814 = vpow2.f32 %v784_v48 }
  0xd3   :  { %v225_v52 = vpop.f32.mrf.mxu1  ;;  %816 = vrcp.f32 %v369_v49  ;;  %vm375_vm1 = vweird.f32 %v369_v49  ;;  %v381_v11 = vand.u32 2147483648, %v369_v49  ;;  %v379_v12 = vand.u32 2147483647, %v369_v49 }
  0xd4   :  { %v310_v53 = vadd.f32 %v309_v51, %v225_v52 }
  0xd5   :  { %v382_v21 = vor.u32 1.1754944e-38, %v381_v11  ;;  %vm380_vm5 = vcmp.eq.f32.partialorder %v379_v12, 8.507059e+37 }
  0xd6   :  { %v363_v54 = vadd.f32 %v355_v50, %v310_v53  ;;  %v504_v44 = vpop.f32.mrf.mxu0  ;;  %v493_v50 = vadd.f32 %v810_v42, %v1238_v56 }
  0xd8   :  { %v783_v55 = vmul.f32 -1.442695, %v363_v54  ;;  %v815_v57 = vpop.eup %814  ;;  %v499_v54 = vadd.f32 %v810_v42, %v498_v15 }
  0xd9   :  { %v817_v58 = vpop.eup %816  ;;  %v408_v60 = vadd.f32 1.0, %v815_v57 }
  0xda   :  { %818 = vpow2.f32 %v783_v55  ;;  %v371_v59 = vmul.f32 %v817_v58, %v369_v49  ;;  %vm376_vm2 = vweird.f32 %v817_v58  ;;  %v487_v49 = vadd.f32 %v810_v42, %v1234_v38 }
  0xdb   :  { %820 = vrcp.f32 %v408_v60  ;;  %vm377_vm3 = vmor %vm375_vm1, %vm376_vm2  ;;  %v420_v35 = vand.u32 2147483648, %v408_v60  ;;  %vm414_vm10 = vweird.f32 %v408_v60  ;;  %v418_v36 = vand.u32 2147483647, %v408_v60 }
  0xdc   :  { %v372_v63 = vsub.f32 1.0, %v371_v59  ;;  %v502_v38 = vadd.f32 %v810_v42, %v501_v33  ;;  %vm719_vm1 = vcmask 1045509   ;;  %vm721_vm2 = vcmask 1046534  }
  0xdd   :  { %v421_v39 = vor.u32 1.1754944e-38, %v420_v35  ;;  %vm419_vm12 = vcmp.eq.f32.partialorder %v418_v36, 8.507059e+37  ;;  %v610_v36 = vpop.permute.xlu0 %609 }
  0xde   :  { %v373_v4 = vmul.f32 %v817_v58, %v372_v63  ;;  %v496_v63 = vadd.f32 %v810_v42, %v1240_v1  ;;  %v505_v1 = vadd.f32 %v810_v42, %v504_v44 }
  0xe0   :  { %v819_v61 = vpop.eup %818  ;;  %v374_v8 = vadd.f32 %v817_v58, %v373_v4 }
  0xe1   :  { %v388_v62 = vadd.f32 1.0, %v819_v61  ;;  %v821_v5 = vpop.eup %820 }
  0xe2   :  { %v410_v10 = vmul.f32 %v821_v5, %v408_v60  ;;  %v378_v17 = vsel %vm377_vm3, %v817_v58, %v374_v8  ;;  %vm415_vm9 = vweird.f32 %v821_v5  ;;  %vm723_vm3 = vcmask 1047559  }
  0xe3   :  { %822 = vrcp.f32 %v388_v62  ;;  %v400_v16 = vand.u32 2147483648, %v388_v62  ;;  %v398_v19 = vand.u32 2147483647, %v388_v62  ;;  %vm394_vm6 = vweird.f32 %v388_v62  ;;  %vm416_vm11 = vmor %vm414_vm10, %vm415_vm9 }
  0xe4   :  { %824 = vtanh.f32 %v364_v7  ;;  %v411_v20 = vsub.f32 1.0, %v410_v10  ;;  %v383_v23 = vsel %vm380_vm5, %v382_v21, %v378_v17  ;;  %v507_v7 = vpop.f32.mrf.mxu0 }
  0xe5   :  { %v401_v25 = vor.u32 1.1754944e-38, %v400_v16  ;;  %vm399_vm8 = vcmp.eq.f32.partialorder %v398_v19, 8.507059e+37  ;;  %v508_v46 = vadd.f32 %v810_v42, %v507_v7 }
  0xe6   :  { %v412_v28 = vmul.f32 %v821_v5, %v411_v20 }
  0xe8   :  { %v413_v34 = vadd.f32 %v821_v5, %v412_v28 }
  0xe9   :  { %v823_v6 = vpop.eup %822 }
  0xea   :  { %v390_v9 = vmul.f32 %v823_v6, %v388_v62  ;;  %vm395_vm4 = vweird.f32 %v823_v6  ;;  %v825_v27 = vpop.eup %824  ;;  %v417_v37 = vsel %vm416_vm11, %v821_v5, %v413_v34  ;;  %v811_v5 = vld [vmem:[%s1272_s10] ss:$0 sm:$0xff]  ;;  %v1069_v34 = vmov 0  }
  0xeb   :  { %vm396_vm7 = vmor %vm394_vm6, %vm395_vm4  ;;  %v425_v30 = vmul.f32 %v825_v27, %v383_v23  ;;  %v422_v41 = vsel %vm419_vm12, %v421_v39, %v417_v37  ;;  %807 = vset.pattern.permute.xlu0 %v1069_v34  ;;  %809 = vset.pattern.permute.xlu1 %v1069_v34  ;;  %vm726_vm4 = vcmask 64512  }
  0xec   :  { %v391_v13 = vsub.f32 1.0, %v390_v9  ;;  %808 = vset.pattern.permute.xlu2 %v1069_v34 }
  0xee   :  { %v392_v18 = vmul.f32 %v823_v6, %v391_v13 }
  0xf0   :  { %v393_v22 = vadd.f32 %v823_v6, %v392_v18 }
  0xf2   :  { %v397_v26 = vsel %vm396_vm7, %v823_v6, %v393_v22 }
  0xf3   :  { %v402_v29 = vsel %vm399_vm8, %v401_v25, %v397_v26 }
  0xf4   :  { %v424_v31 = vmul.f32 %v402_v29, %v115_v24 }
  0xf6   :  { %v426_v32 = vadd.f32 %v425_v30, %v424_v31  ;;  %v603_v30 = vpop.permute.xlu2 %602  ;;  %v617_v31 = vpop.permute.xlu1 %616 }
  0xf8   :  { %826 = vtanh.f32 %v426_v32  ;;  %430 = vst [vmem:[#allocation14] sm:$0xff] %v426_v32 }
  0xfe   :  { %v827_v40 = vpop.eup %826  ;;  %v624_v32 = vpop.permute.xlu2 %623 }
  0xff   :  { %v428_v43 = vmul.f32 %v827_v40, %v422_v41  ;;  %v638_v33 = vpop.permute.xlu1 %637 }
 0x101   :  { %429 = vst [vmem:[#allocation12] sm:$0xff] %v428_v43  ;;  %v512_v45 = vrot.slane %v428_v43, 2  ;;  %v513_v47 = vrot.slane %v428_v43, 3  ;;  %v514_v48 = vrot.slane %v428_v43, 4  ;;  %v518_v51 = vperm.slane %v428_v43, 0 }
 0x102   :  { %v511_v52 = vrot.slane %v428_v43, 1  ;;  %v515_v57 = vrot.slane %v428_v43, 5  ;;  %v516_v3 = vrot.slane %v428_v43, 6  ;;  %v517_v4 = vrot.slane %v428_v43, 7  ;;  %749 = dma.vmem_to_hbm [thread:$0]  %s745_s28, 128, %s747_s26, [#allocation13]  }
 0x103   :  { %v520_v53 = vperm.slane %v512_v45, 0  ;;  %v522_v55 = vperm.slane %v514_v48, 0  ;;  %v521_v58 = vperm.slane %v513_v47, 0  ;;  %v534_v59 = vadd.f32 %v518_v51, %v487_v49  ;;  %760 = dma.vmem_to_hbm [thread:$0]  %s756_s14, 128, %s758_s30, [#allocation13]  }
 0x104   :  { %v519_v62 = vperm.slane %v511_v52, 0  ;;  %v523_v2 = vperm.slane %v515_v57, 0  ;;  %v524_v10 = vperm.slane %v516_v3, 0  ;;  %v525_v12 = vperm.slane %v517_v4, 0 }
 0x105   :  { %v536_v60 = vadd.f32 %v520_v53, %v493_v50  ;;  %v538_v61 = vadd.f32 %v522_v55, %v499_v54  ;;  %828 = vtanh.f32 %v534_v59  ;;  %v537_v56 = vadd.f32 %v521_v58, %v496_v63 }
 0x106   :  { %v535_v6 = vadd.f32 %v519_v62, %v490_v0  ;;  %v539_v8 = vadd.f32 %v523_v2, %v502_v38  ;;  %v540_v17 = vadd.f32 %v524_v10, %v505_v1  ;;  %v541_v19 = vadd.f32 %v525_v12, %v508_v46  ;;  %v631_v35 = vpop.permute.xlu2 %630 }
 0x107   :  { %830 = vtanh.f32 %v536_v60  ;;  %v652_v37 = vpop.permute.xlu1 %651  ;;  %v702_v1 = vand.u32 127, %v598_v14 }
 0x108   :  { %832 = vtanh.f32 %v538_v61 }
 0x109   :  { %834 = vtanh.f32 %v537_v56 }
 0x10a   :  { %836 = vtanh.f32 %v535_v6 }
 0x10b   :  { %v829_v9 = vpop.eup %828  ;;  %838 = vtanh.f32 %v539_v8 }
 0x10c   :  { %v554_v13 = vmul.f32 %v829_v9, %v811_v5  ;;  %840 = vtanh.f32 %v540_v17 }
 0x10d   :  { %v831_v11 = vpop.eup %830  ;;  %842 = vtanh.f32 %v541_v19 }
 0x10e   :  { %v556_v15 = vmul.f32 %v831_v11, %v811_v5  ;;  %v833_v16 = vpop.eup %832  ;;  %562 = vadd.xlane.f32.xlu0 %v554_v13  ;;  %v645_v39 = vpop.permute.xlu2 %644 }
 0x10f   :  { %v558_v18 = vmul.f32 %v833_v16, %v811_v5  ;;  %v835_v20 = vpop.eup %834 }
 0x110   :  { %566 = vadd.xlane.f32.xlu1 %v556_v15  ;;  %v837_v21 = vpop.eup %836  ;;  %v557_v24 = vmul.f32 %v835_v20, %v811_v5 }
 0x111   :  { %570 = vadd.xlane.f32.xlu2 %v558_v18  ;;  %v839_v22 = vpop.eup %838  ;;  %v555_v23 = vmul.f32 %v837_v21, %v811_v5 }
 0x112   :  { %v559_v25 = vmul.f32 %v839_v22, %v811_v5  ;;  %v841_v26 = vpop.eup %840 }
 0x113   :  { %v843_v27 = vpop.eup %842  ;;  %v560_v28 = vmul.f32 %v841_v26, %v811_v5 }
 0x114   :  { %v561_v29 = vmul.f32 %v843_v27, %v811_v5 }
 0x116   :  { %564 = vadd.xlane.f32.xlu0 %v555_v23 }
 0x118   :  { %568 = vadd.xlane.f32.xlu1 %v557_v24 }
 0x119   :  { %572 = vadd.xlane.f32.xlu2 %v559_v25 }
 0x11e   :  { %574 = vadd.xlane.f32.xlu0 %v560_v28 }
 0x120   :  { %576 = vadd.xlane.f32.xlu1 %v561_v29 }
 0x181   :  { %v563_v40 = vpop.xlane.xlu0 %562 }
 0x182   :  { %844 = vtanh.f32 %v563_v40 }
 0x183   :  { %v567_v41 = vpop.xlane.xlu1 %566 }
 0x184   :  { %846 = vtanh.f32 %v567_v41  ;;  %v571_v42 = vpop.xlane.xlu2 %570 }
 0x185   :  { %848 = vtanh.f32 %v571_v42 }
 0x188   :  { %v845_v43 = vpop.eup %844 }
 0x189   :  { %v586_v45 = vmul.f32 10.0, %v845_v43  ;;  %v565_v47 = vpop.xlane.xlu0 %564 }
 0x18a   :  { %v847_v44 = vpop.eup %846  ;;  %850 = vtanh.f32 %v565_v47 }
 0x18b   :  { %v588_v48 = vmul.f32 10.0, %v847_v44  ;;  %v569_v49 = vpop.xlane.xlu1 %568  ;;  %v661_v50 = vadd.f32 %v603_v30, %v586_v45  ;;  %v849_v53 = vpop.eup %848 }
 0x18c   :  { %v573_v51 = vpop.xlane.xlu2 %572  ;;  %v590_v55 = vmul.f32 10.0, %v849_v53 }
 0x18d   :  { %v663_v52 = vadd.f32 %v617_v31, %v588_v48  ;;  %852 = vtanh.f32 %v573_v51  ;;  %678 = vperm.xlu0 %807, %v661_v50  }
 0x18e   :  { %854 = vtanh.f32 %v569_v49  ;;  %v665_v0 = vadd.f32 %v631_v35, %v590_v55 }
 0x18f   :  { %684 = vperm.xlu1 %809, %v663_v52  }
 0x190   :  { %v851_v54 = vpop.eup %850 }
 0x191   :  { %v587_v57 = vmul.f32 10.0, %v851_v54  ;;  %v575_v60 = vpop.xlane.xlu0 %574 }
 0x193   :  { %v577_v58 = vpop.xlane.xlu1 %576  ;;  %v853_v59 = vpop.eup %852  ;;  %v662_v61 = vadd.f32 %v610_v36, %v587_v57 }
 0x194   :  { %856 = vtanh.f32 %v577_v58  ;;  %v855_v62 = vpop.eup %854  ;;  %v591_v63 = vmul.f32 10.0, %v853_v59 }
 0x195   :  { %681 = vperm.xlu2 %808, %v662_v61   ;;  %858 = vtanh.f32 %v575_v60  ;;  %v589_v2 = vmul.f32 10.0, %v855_v62 }
 0x196   :  { %v666_v38 = vadd.f32 %v638_v33, %v591_v63 }
 0x197   :  { %690 = vperm.xlu1 %809, %v665_v0   ;;  %v664_v4 = vadd.f32 %v624_v32, %v589_v2 }
 0x198   :  { %693 = vperm.xlu0 %807, %v666_v38  }
 0x19a   :  { %v857_v56 = vpop.eup %856 }
 0x19b   :  { %v593_v3 = vmul.f32 10.0, %v857_v56  ;;  %v859_v5 = vpop.eup %858 }
 0x19c   :  { %v592_v7 = vmul.f32 10.0, %v859_v5 }
 0x19d   :  { %v668_v6 = vadd.f32 %v652_v37, %v593_v3  ;;  %687 = vperm.xlu2 %808, %v664_v4  }
 0x19e   :  { %v667_v8 = vadd.f32 %v645_v39, %v592_v7 }
 0x19f   :  { %699 = vperm.xlu1 %809, %v668_v6  }
 0x1a5   :  { %696 = vperm.xlu2 %808, %v667_v8  }
 0x1ef   :  { %v682_v9 = vpop.permute.xlu2 %681 }
 0x1f0   :  { %v704_v12 = vperm.slane %v682_v9, %v702_v1 }
 0x1f7   :  { %v688_v13 = vpop.permute.xlu2 %687 }
 0x1f8   :  { %v706_v19 = vperm.slane %v688_v13, %v702_v1 }
 0x1ff   :  { %v679_v10 = vpop.permute.xlu0 %678  ;;  %v697_v14 = vpop.permute.xlu2 %696 }
 0x200   :  { %v703_v46 = vperm.slane %v679_v10, %v702_v1  ;;  %v709_v26 = vperm.slane %v697_v14, %v702_v1 }
 0x201   :  { %v685_v11 = vpop.permute.xlu1 %684 }
 0x202   :  { %v705_v15 = vperm.slane %v685_v11, %v702_v1  ;;  %v712_v16 = vsel %vm711_vm13, %v704_v12, %v703_v46 }
 0x204   :  { %v714_v17 = vsel %vm713_vm14, %v705_v15, %v712_v16 }
 0x205   :  { %v716_v22 = vsel %vm715_vm15, %v706_v19, %v714_v17 }
 0x209   :  { %v691_v18 = vpop.permute.xlu1 %690 }
 0x20a   :  { %v707_v20 = vperm.slane %v691_v18, %v702_v1  ;;  %v694_v21 = vpop.permute.xlu0 %693 }
 0x20b   :  { %v708_v23 = vperm.slane %v694_v21, %v702_v1 }
 0x20c   :  { %v718_v24 = vsel %vm717_vm0, %v707_v20, %v716_v22 }
 0x20d   :  { %v720_v25 = vsel %vm719_vm1, %v708_v23, %v718_v24 }
 0x20e   :  { %v722_v29 = vsel %vm721_vm2, %v709_v26, %v720_v25 }
 0x211   :  { %v700_v27 = vpop.permute.xlu1 %699 }
 0x212   :  { %v710_v28 = vperm.slane %v700_v27, %v702_v1 }
 0x214   :  { %v724_v30 = vsel %vm723_vm3, %v710_v28, %v722_v29 }
 0x215   :  { %727 = vst.msk [vmem:[#allocation11] sm:$0xff] %vm726_vm4, %v724_v30 }
 0x216   :  { %738 = dma.vmem_to_hbm [thread:$0]  %s734_s2, 128, %s736_s5, [#allocation4]  }
 0x217   :  { %1058 = dma.done.wait [#allocation4], 128  }
 0x218   :  { %1059 = vsyncadd [#allocation4], 4294967168 }
 0x219   :  { %1060 = dma.done.wait [#allocation13], 256  }
 0x21a   :  { %1061 = vsyncadd [#allocation13], 4294967040 }
 0x21b   :  { %773 = vsyncpa [#allocation3], 1 }
 0x21c   :  { %774 = vsyncpa [#allocation6], 1 }
 0x21d   :  { %775 = vsyncpa [#allocation9], 1 }
 0x21e   :  { %776 = vsyncpa [#allocation4], 1 }
 0x21f   :  { %777 = vsyncpa [#allocation13], 1 }

</bundles_post_ra>
